<compile_context>
chip_gen: v7x
topology: tpu7x:2x2x1
jax: 0.10.0
libtpu: 0.0.40
codegen_flags: <defaults>
</compile_context>

<pallas_src>
import functools

import jax
import jax.numpy as jnp
from jax.experimental import pallas as pl
from jax.experimental.pallas import tpu as pltpu

_VMEM_LIMIT_BYTES = 48 * 1024 * 1024      # <= v7x 64 MiB physical, fine on v5e/v6e
_RESIDENT_BUDGET_BYTES = 40 * 1024 * 1024  # headroom under the scoped limit


def _round_up(x, m):
    return ((x + m - 1) // m) * m


def _pick_tile(n_pad, target):
    """Largest multiple of 128 <= target that divides n_pad (n_pad % 128 == 0)."""
    t = min(_round_up(target, 128), n_pad)
    t = max(128, (t // 128) * 128)
    while n_pad % t:
        t -= 128
    return t


# ---------------------------------------------------------------------------
# Kernel 1: feature projection  XW1 = X @ W1  (tiny K; done once per forward
# so the adjacency reduction loop stays pure MXU accumulate).
# ---------------------------------------------------------------------------
def project_kernel(x_ref, w_ref, out_ref):
    out_ref[...] = jnp.dot(
        x_ref[...], w_ref[...], preferred_element_type=jnp.float32
    ).astype(out_ref.dtype)


def project(x, w, *, tile_m):
    n_pad, fin = x.shape
    fout = w.shape[1]
    return pl.pallas_call(
        project_kernel,
        out_shape=jax.ShapeDtypeStruct((n_pad, fout), jnp.bfloat16),
        grid_spec=pltpu.PrefetchScalarGridSpec(
            num_scalar_prefetch=0,
            grid=(n_pad // tile_m,),
            in_specs=[
                pl.BlockSpec((tile_m, fin), lambda i: (i, 0)),
                pl.BlockSpec((fin, fout), lambda i: (0, 0)),
            ],
            out_specs=pl.BlockSpec((tile_m, fout), lambda i: (i, 0)),
        ),
        compiler_params=pltpu.CompilerParams(dimension_semantics=("parallel",)),
        cost_estimate=pl.CostEstimate(
            flops=2 * n_pad * fin * fout,
            transcendentals=0,
            bytes_accessed=x.size * x.dtype.itemsize
            + w.size * w.dtype.itemsize
            + n_pad * fout * 2,
        ),
    )(x, w)


# ---------------------------------------------------------------------------
# Kernel 2: tiled aggregation  out = Ahat @ XW  (+ bias, optional ReLU,
# optional fused next-layer projection @ W_next emitted in bf16).
# grid = (row tiles [parallel], K reduction tiles [arbitrary, last]).
# ---------------------------------------------------------------------------
def aggregate_kernel(*refs, tile_k, apply_relu, fuse_w, resident_xw):
    if fuse_w:
        adj_ref, xw_ref, b_ref, w_ref, out_ref, acc_ref = refs
    else:
        adj_ref, xw_ref, b_ref, out_ref, acc_ref = refs
        w_ref = None

    k = pl.program_id(1)

    @pl.when(k == 0)
    def _():
        acc_ref[...] = jnp.zeros_like(acc_ref)

    if resident_xw:
        # XW lives fully in VMEM (fetched once); slice the current K window.
        start = pl.multiple_of(k * tile_k, tile_k)
        rhs = xw_ref[pl.ds(start, tile_k), :]
    else:
        rhs = xw_ref[...]

    acc_ref[...] += jnp.dot(adj_ref[...], rhs, preferred_element_type=jnp.float32)

    @pl.when(k == pl.num_programs(1) - 1)
    def _():
        h = acc_ref[...] + b_ref[...]
        if apply_relu:
            h = jnp.maximum(h, 0.0)
        if fuse_w:
            # Fused next-layer projection: emit (Ahat @ XW -> relu) @ W_next.
            h = jnp.dot(h.astype(w_ref.dtype), w_ref[...],
                        preferred_element_type=jnp.float32)
        out_ref[...] = h.astype(out_ref.dtype)


def aggregate(adj, xw, b, w_next=None, *, tile_m, tile_k, apply_relu, out_dtype):
    n_pad = adj.shape[0]
    f = xw.shape[1]
    fuse_w = w_next is not None
    f_out = w_next.shape[1] if fuse_w else f
    out_itemsize = jnp.dtype(out_dtype).itemsize

    # Keep XW fully resident in VMEM if it (plus double-buffered adj tiles,
    # f32 accumulator, outputs, fused weight) fits; else stream per K tile.
    resident_bytes = (
        2 * tile_m * tile_k * 2            # adj tiles, double-buffered bf16
        + 2 * n_pad * f * 2                # resident XW (conservative x2)
        + tile_m * f * 4                   # f32 accumulator scratch
        + 2 * tile_m * f_out * out_itemsize
        + (2 * f * f_out * 2 if fuse_w else 0)
    )
    resident_xw = resident_bytes <= _RESIDENT_BUDGET_BYTES

    xw_spec = (
        pl.BlockSpec((n_pad, f), lambda i, k: (0, 0))        # fetched once
        if resident_xw
        else pl.BlockSpec((tile_k, f), lambda i, k: (k, 0))   # streamed fallback
    )
    in_specs = [
        pl.BlockSpec((tile_m, tile_k), lambda i, k: (i, k)),
        xw_spec,
        pl.BlockSpec((1, f), lambda i, k: (0, 0)),
    ]
    inputs = [adj, xw, b]
    if fuse_w:
        in_specs.append(pl.BlockSpec((f, f_out), lambda i, k: (0, 0)))
        inputs.append(w_next)

    kernel = functools.partial(
        aggregate_kernel,
        tile_k=tile_k,
        apply_relu=apply_relu,
        fuse_w=fuse_w,
        resident_xw=resident_xw,
    )

    xw_reads = 1 if resident_xw else (n_pad // tile_m)
    flops = 2 * n_pad * n_pad * f + (2 * n_pad * f * f_out if fuse_w else 0)

    return pl.pallas_call(
        kernel,
        out_shape=jax.ShapeDtypeStruct((n_pad, f_out), out_dtype),
        grid_spec=pltpu.PrefetchScalarGridSpec(
            num_scalar_prefetch=0,
            grid=(n_pad // tile_m, n_pad // tile_k),
            in_specs=in_specs,
            out_specs=pl.BlockSpec((tile_m, f_out), lambda i, k: (i, 0)),
            scratch_shapes=[pltpu.VMEM((tile_m, f), jnp.float32)],
        ),
        compiler_params=pltpu.CompilerParams(
            dimension_semantics=("parallel", "arbitrary"),
            vmem_limit_bytes=_VMEM_LIMIT_BYTES,
        ),
        cost_estimate=pl.CostEstimate(
            flops=flops,
            transcendentals=0,
            bytes_accessed=adj.size * adj.dtype.itemsize
            + xw_reads * xw.size * xw.dtype.itemsize
            + n_pad * f_out * out_itemsize,
        ),
    )(*inputs)


def gcn_forward(adj_hat, x, w1, b1, w2, b2, *, tile_m=512, tile_k=1024):
    """2-layer GCN: relu(Ahat @ (X @ W1) + b1) -> Ahat @ (h @ W2) + b2."""
    n, in_feats = x.shape
    h_feats = w1.shape[1]
    num_classes = w2.shape[1]

    # Minimal node padding (no lcm blow-up): small base for small graphs, then
    # pick tiles that divide n_pad.  Feature dims padded to multiples of 128 so
    # every store is lane-dense; padded rows/cols are zero => no effect.
    base = 128 if n <= 1024 else 512
    n_pad = _round_up(n, base)
    tm = _pick_tile(n_pad, tile_m)
    # Keep >= 2 row tiles when possible so v7x megacore can shard them evenly.
    if n_pad // tm < 2 and n_pad >= 256:
        tm = _pick_tile(n_pad, n_pad // 2)
    tk = _pick_tile(n_pad, tile_k)

    in_pad = _round_up(in_feats, 128)
    h_pad = _round_up(h_feats, 128)
    c_pad = _round_up(num_classes, 128)

    adj_p = jnp.pad(adj_hat, ((0, n_pad - n), (0, n_pad - n))).astype(jnp.bfloat16)
    x_p = jnp.pad(x, ((0, n_pad - n), (0, in_pad - in_feats))).astype(jnp.bfloat16)
    w1_p = jnp.pad(w1, ((0, in_pad - in_feats), (0, h_pad - h_feats))).astype(jnp.bfloat16)
    b1_p = jnp.pad(b1.reshape(1, -1), ((0, 0), (0, h_pad - h_feats))).astype(jnp.float32)
    w2_p = jnp.pad(w2, ((0, h_pad - h_feats), (0, c_pad - num_classes))).astype(jnp.bfloat16)
    b2_p = jnp.pad(b2.reshape(1, -1), ((0, 0), (0, c_pad - num_classes))).astype(jnp.float32)

    # Layer 1 projection: XW1 = X @ W1 (bf16).
    xw1 = project(x_p, w1_p, tile_m=tm)

    # Layer 1 aggregation with fused ReLU + layer-2 projection:
    #   hw2 = relu(Ahat @ XW1 + b1) @ W2   (written directly in bf16).
    hw2 = aggregate(adj_p, xw1, b1_p, w2_p, tile_m=tm, tile_k=tk,
                    apply_relu=True, out_dtype=jnp.bfloat16)

    # Layer 2 aggregation: out = Ahat @ hw2 + b2 (f32).
    out_p = aggregate(adj_p, hw2, b2_p, None, tile_m=tm, tile_k=tk,
                      apply_relu=False, out_dtype=jnp.float32)

    return out_p[:n, :num_classes]


def gcn_reference(adj_hat, x, w1, b1, w2, b2):
    """Pure-JAX reference applying the same bf16 casts as the kernel pipeline."""
    f32 = jnp.float32
    hp = jax.lax.Precision.HIGHEST
    adj = adj_hat.astype(jnp.bfloat16).astype(f32)
    xw1 = jnp.dot(x.astype(jnp.bfloat16).astype(f32),
                  w1.astype(jnp.bfloat16).astype(f32), precision=hp)
    xw1 = xw1.astype(jnp.bfloat16).astype(f32)
    h1 = jnp.maximum(jnp.dot(adj, xw1, precision=hp) + b1, 0.0)
    hw2 = jnp.dot(h1.astype(jnp.bfloat16).astype(f32),
                  w2.astype(jnp.bfloat16).astype(f32), precision=hp)
    hw2 = hw2.astype(jnp.bfloat16).astype(f32)
    return jnp.dot(adj, hw2, precision=hp) + b2


def build_normalized_adjacency(n, key):
    # Deterministic random undirected graph with self-loops, Ahat = D^-1/2 A D^-1/2.
    probs = jax.random.uniform(key, (n, n))
    a = (probs < 0.3).astype(jnp.float32)
    a = jnp.maximum(a, a.T)
    a = a.at[jnp.arange(n), jnp.arange(n)].set(1.0)
    deg = jnp.clip(a.sum(axis=1), 1.0)
    d_inv_sqrt = 1.0 / jnp.sqrt(deg)
    return a * d_inv_sqrt[:, None] * d_inv_sqrt[None, :]


def glorot(key, shape):
    fan_in, fan_out = shape
    limit = jnp.sqrt(6.0 / (fan_in + fan_out))
    return jax.random.uniform(key, shape, jnp.float32, -limit, limit)


if __name__ == "__main__":
    N, IN_FEATS, H_FEATS, NUM_CLASSES = 16, 8, 32, 4

    key = jax.random.PRNGKey(0)
    k_adj, k_x, k_w1, k_w2 = jax.random.split(key, 4)

    adj_hat = build_normalized_adjacency(N, k_adj)
    x = jax.random.normal(k_x, (N, IN_FEATS), jnp.float32)

    # Deterministic parameter init (DGL GraphConv: xavier-uniform weight, zero bias).
    w1 = glorot(k_w1, (IN_FEATS, H_FEATS))
    b1 = jnp.zeros((1, H_FEATS), jnp.float32)
    w2 = glorot(k_w2, (H_FEATS, NUM_CLASSES))
    b2 = jnp.zeros((1, NUM_CLASSES), jnp.float32)

    out = gcn_forward(adj_hat, x, w1, b1, w2, b2)
    out = jax.block_until_ready(out)
    assert out.shape == (N, NUM_CLASSES)

    # Tight check against a cast-matched reference (same bf16 streaming points).
    ref = gcn_reference(adj_hat, x, w1, b1, w2, b2)
    assert jnp.allclose(out, ref, atol=2e-3, rtol=2e-3), float(jnp.max(jnp.abs(out - ref)))

    # Loose check against pure-f32 math to confirm module semantics.
    h_f32 = jnp.maximum(adj_hat @ (x @ w1) + b1, 0.0)
    ref_f32 = adj_hat @ (h_f32 @ w2) + b2
    assert jnp.allclose(out, ref_f32, atol=5e-2, rtol=5e-2)

    print("KERNEL_OK")
</pallas_src>

<mosaic_0001>
module attributes {stable_mosaic.version = 11 : i64} {
  func.func @project_kernel(%arg0: i32, %arg1: memref<128x128xbf16, #tpu.memory_space<vmem>>, %arg2: memref<128x128xbf16, #tpu.memory_space<vmem>>, %arg3: memref<128x128xbf16, #tpu.memory_space<vmem>>) attributes {dimension_semantics = [#tpu.dimension_semantics<parallel>], iteration_bounds = array<i64: 1>, scalar_prefetch = 0 : i64, scratch_operands = 0 : i64, tpu.core_type = #tpu.core_type<tc>, window_params = [{transform_indices = @transform_0, window_bounds = array<i64: 128, 128>}, {pipeline_mode = #tpu.pipeline_mode<synchronous>, transform_indices = @transform_1, window_bounds = array<i64: 128, 128>}, {transform_indices = @transform_2, window_bounds = array<i64: 128, 128>}]} {
    %c0 = arith.constant 0 : index
    %c0_0 = arith.constant 0 : index
    %0 = vector.load %arg1[%c0, %c0_0] : memref<128x128xbf16, #tpu.memory_space<vmem>>, vector<128x128xbf16>
    %c0_1 = arith.constant 0 : index
    %c0_2 = arith.constant 0 : index
    %1 = vector.load %arg2[%c0_1, %c0_2] : memref<128x128xbf16, #tpu.memory_space<vmem>>, vector<128x128xbf16>
    %cst = arith.constant dense<0.000000e+00> : vector<128x128xf32>
    %2 = tpu.matmul %0, %1, %cst {dimension_numbers = #tpu.dot_dimension_numbers<[1], [0], [0], [1], [0, 0, 1, 1], [], []>} : vector<128x128xbf16>, vector<128x128xbf16>, vector<128x128xf32> -> vector<128x128xf32>
    %3 = arith.truncf %2 : vector<128x128xf32> to vector<128x128xbf16>
    %c0_3 = arith.constant 0 : index
    %c0_4 = arith.constant 0 : index
    %4 = vector.load %arg3[%c0_3, %c0_4] : memref<128x128xbf16, #tpu.memory_space<vmem>>, vector<128x128xbf16>
    tpu.vector_store %arg3[%c0_3, %c0_4], %3 {strides = array<i32>} : memref<128x128xbf16, #tpu.memory_space<vmem>>, vector<128x128xbf16>,
    return
  }
  func.func @transform_0(%arg0: i32) -> (i32, i32) {
    %c0_i32 = arith.constant 0 : i32
    %c0_i32_0 = arith.constant 0 : i32
    return %arg0, %c0_i32 : i32, i32
  }
  func.func @transform_1(%arg0: i32) -> (i32, i32) {
    %c0_i32 = arith.constant 0 : i32
    %c0_i32_0 = arith.constant 0 : i32
    %c0_i32_1 = arith.constant 0 : i32
    return %c0_i32, %c0_i32_0 : i32, i32
  }
  func.func @transform_2(%arg0: i32) -> (i32, i32) {
    %c0_i32 = arith.constant 0 : i32
    %c0_i32_0 = arith.constant 0 : i32
    return %arg0, %c0_i32 : i32, i32
  }
}

</mosaic_0001>

<bundles_post_ra>
// kernel: tpu_custom_call.1
= control target key start
LH: loop header
LB: loop body
LE: loop exit
PB: predicated region body
PF: predicated region fallthrough
CT: control target
= control target key end

     0   :  { %7 = vsyncpa [#allocation3], 0  ;;  %s681_s0 = inlined_call_operand.hbm [shape: bf16[128,128], index: 0, kind: input, shape index: {}]   ;;  %s682_s1 = inlined_call_operand.hbm [shape: bf16[128,128], index: 1, kind: input, shape index: {}]   ;;  %s683_s2 = inlined_call_operand.hbm [shape: bf16[128,128], index: 2, kind: output, shape index: {}]  }
   0x1   :  { %8 = vsyncpa [#allocation6], 0 }
   0x2   :  { %9 = vsyncpa [#allocation4], 0  ;;  %s616_s9 = smov [#allocation2]   ;;  %s544_s13 = scalar_lea.hbm %s681_s0, 1024 }
   0x3   :  { %s15_s10 = sshll.u32 %s616_s9, 4  ;;  %p545_p0 = scmp.ne.s32.totalorder %s681_s0, %s544_s13  ;;  %s16_s10 = int_to_ptr.vmem [resolvable:$true] %s15_s10 }
   0x4   :  { %p548_p1 = scmp.lt.u32.totalorder %s544_s13, %s681_s0 }
   0x6   :  { %p550_p2 = pnand %p548_p1, %p545_p0 }
   0x8   :  { %553 = shalt.err (!%p550_p2)
}
   0x9   :  { %s554_s18 = scalar_lea.vmem %s16_s10, 1024  ;;  %p559_p4 = scmp.lt.s32.totalorder %s16_s10, %s16_s10 }
   0xa   :  { %p555_p3 = scmp.ne.s32.totalorder %s16_s10, %s554_s18  ;;  %p560_p5 = scmp.lt.s32.totalorder %s554_s18, %s554_s18 }
   0xc   :  { %p561_p6 = por %p560_p5, %p559_p4 }
   0xe   :  { %p562_p7 = pnand %p561_p6, %p555_p3 }
  0x10   :  { %565 = shalt.err (!%p562_p7)
}
  0x11   :  { %s617_s19 = smov 64   ;;  %s618_s20 = smov 4  }
  0x12   :  { %21 = dma.hbm_to_vmem [thread:$0]  %s681_s0, 1024, %s16_s10, [#allocation3], %s617_s19, %s617_s19, %s618_s20  }
  0x13   :  { %s619_s23 = smov [#allocation5]   ;;  %s566_s27 = scalar_lea.hbm %s682_s1, 1024 }
  0x14   :  { %s27_s24 = sshll.u32 %s619_s23, 4  ;;  %p567_p8 = scmp.ne.s32.totalorder %s682_s1, %s566_s27  ;;  %s28_s24 = int_to_ptr.vmem [resolvable:$true] %s27_s24 }
  0x15   :  { %p570_p9 = scmp.lt.u32.totalorder %s566_s27, %s682_s1 }
  0x17   :  { %p572_p10 = pnand %p570_p9, %p567_p8 }
  0x19   :  { %575 = shalt.err (!%p572_p10)
}
  0x1a   :  { %s576_s4 = scalar_lea.vmem %s28_s24, 1024  ;;  %p581_p12 = scmp.lt.s32.totalorder %s28_s24, %s28_s24 }
  0x1b   :  { %p577_p11 = scmp.ne.s32.totalorder %s28_s24, %s576_s4  ;;  %p582_p13 = scmp.lt.s32.totalorder %s576_s4, %s576_s4 }
  0x1d   :  { %p583_p0 = por %p582_p13, %p581_p12 }
  0x1f   :  { %p584_p1 = pnand %p583_p0, %p577_p11 }
  0x21   :  { %587 = shalt.err (!%p584_p1)
}
  0x22   :  { %33 = dma.hbm_to_vmem [thread:$0]  %s682_s1, 1024, %s28_s24, [#allocation6], %s617_s19, %s617_s19, %s618_s20  }
  0x23   :  { %610 = dma.done.wait [#allocation3], 1024  }
  0x24   :  { %611 = vsyncadd [#allocation3], 4294966272 }
  0x25   :  { %612 = dma.done.wait [#allocation6], 1024  }
  0x26   :  { %613 = vsyncadd [#allocation6], 4294966272  ;;  %v528_v0 = vld [vmem:[#allocation5] sm:$0xff]   ;;  %v529_v1 = vld [vmem:[#allocation5 + $0x8] sm:$0xff]   ;;  %s620_s1 = smov [#allocation7]  }
  0x27   :  { %475 = vmatprep.subr.bf16.mxu0 %v528_v0  ;;  %507 = vmatprep.subr.bf16.mxu1 %v528_v0  ;;  %v530_v2 = vld [vmem:[#allocation5 + $0x10] sm:$0xff]   ;;  %v531_v3 = vld [vmem:[#allocation5 + $0x18] sm:$0xff]   ;;  %v536_v4 = vld [vmem:[#allocation2] sm:$0xff]   ;;  %s351_s6 = sshll.u32 %s620_s1, 4  ;;  %s352_s6 = int_to_ptr.vmem [resolvable:$true] %s351_s6 }
  0x28   :  { %476 = vmatpush3.bf16.msra.mxu0 %v528_v0  ;;  %515 = vmatpush3.bf16.msra.mxu1 %v528_v0  ;;  %v537_v5 = vld [vmem:[#allocation2 + $0x20] sm:$0xff]   ;;  %v533_v7 = vld [vmem:[#allocation5 + $0x28] sm:$0xff]   ;;  %v534_v8 = vld [vmem:[#allocation5 + $0x30] sm:$0xff]   ;;  %s588_s7 = scalar_lea.vmem %s352_s6, 1024  ;;  %p593_p3 = scmp.lt.s32.totalorder %s352_s6, %s352_s6 }
  0x29   :  { %477 = vmatprep.subr.bf16.mxu0 %v529_v1  ;;  %508 = vmatprep.subr.bf16.mxu1 %v529_v1  ;;  %v532_v6 = vld [vmem:[#allocation5 + $0x20] sm:$0xff]   ;;  %v535_v9 = vld [vmem:[#allocation5 + $0x38] sm:$0xff]   ;;  %v538_v10 = vld [vmem:[#allocation2 + $0x8] sm:$0xff]   ;;  %p589_p2 = scmp.ne.s32.totalorder %s352_s6, %s588_s7  ;;  %p594_p4 = scmp.lt.s32.totalorder %s588_s7, %s588_s7 }
  0x2a   :  { %491 = vmatprep.mubr.bf16.mxu0 %v536_v4  ;;  %499 = vmatprep.mubr.bf16.mxu1 %v537_v5  ;;  %v539_v11 = vld [vmem:[#allocation2 + $0x28] sm:$0xff]   ;;  %v540_v12 = vld [vmem:[#allocation2 + $0x10] sm:$0xff]   ;;  %v542_v14 = vld [vmem:[#allocation2 + $0x18] sm:$0xff]  }
  0x2b   :  { %v541_v13 = vld [vmem:[#allocation2 + $0x30] sm:$0xff]   ;;  %v543_v15 = vld [vmem:[#allocation2 + $0x38] sm:$0xff]   ;;  %p595_p5 = por %p594_p4, %p593_p3 }
  0x2c   :  { %478 = vmatpush3.bf16.msra.mxu0 %v529_v1  ;;  %516 = vmatpush3.bf16.msra.mxu1 %v529_v1 }
  0x2d   :  { %479 = vmatprep.subr.bf16.mxu0 %v530_v2  ;;  %509 = vmatprep.subr.bf16.mxu1 %v530_v2  ;;  %p596_p6 = pnand %p595_p5, %p589_p2 }
  0x30   :  { %480 = vmatpush3.bf16.msra.mxu0 %v530_v2  ;;  %517 = vmatpush3.bf16.msra.mxu1 %v530_v2 }
  0x31   :  { %481 = vmatprep.subr.bf16.mxu0 %v531_v3  ;;  %510 = vmatprep.subr.bf16.mxu1 %v531_v3 }
  0x34   :  { %482 = vmatpush3.bf16.msra.mxu0 %v531_v3  ;;  %518 = vmatpush3.bf16.msra.mxu1 %v531_v3 }
  0x35   :  { %483 = vmatprep.subr.bf16.mxu0 %v532_v6  ;;  %511 = vmatprep.subr.bf16.mxu1 %v532_v6 }
  0x38   :  { %484 = vmatpush3.bf16.msra.mxu0 %v532_v6  ;;  %519 = vmatpush3.bf16.msra.mxu1 %v532_v6 }
  0x39   :  { %485 = vmatprep.subr.bf16.mxu0 %v533_v7  ;;  %512 = vmatprep.subr.bf16.mxu1 %v533_v7 }
  0x3c   :  { %486 = vmatpush3.bf16.msra.mxu0 %v533_v7  ;;  %520 = vmatpush3.bf16.msra.mxu1 %v533_v7 }
  0x3d   :  { %487 = vmatprep.subr.bf16.mxu0 %v534_v8  ;;  %513 = vmatprep.subr.bf16.mxu1 %v534_v8 }
  0x40   :  { %488 = vmatpush3.bf16.msra.mxu0 %v534_v8  ;;  %521 = vmatpush3.bf16.msra.mxu1 %v534_v8 }
  0x41   :  { %489 = vmatprep.subr.bf16.mxu0 %v535_v9  ;;  %514 = vmatprep.subr.bf16.mxu1 %v535_v9 }
  0x44   :  { %490 = vmatpush3.bf16.msra.mxu0 %v535_v9  ;;  %522 = vmatpush3.bf16.msra.mxu1 %v535_v9 }
  0x47   :  { %492 = vmatmul.mubr.bf16.vlgmr.msra.gmra.mrb[0].mxu0 %v538_v10  ;;  %500 = vmatmul.mubr.bf16.vlgmr.msra.gmra.mrb[0].mxu1 %v539_v11 }
  0x48   :  { %495 = vmatprep.mubr.bf16.mxu0 %v540_v12  ;;  %503 = vmatprep.mubr.bf16.mxu1 %v541_v13 }
  0x4f   :  { %496 = vmatmul.mubr.bf16.gmra.mrb[4].mxu0 %v542_v14  ;;  %504 = vmatmul.mubr.bf16.gmra.mrb[4].mxu1 %v543_v15 }
 0x11a   :  { %v493_v16 = vpop.f32.mrb[0].mxu0  ;;  %v501_v17 = vpop.f32.mrb[0].mxu1 }
 0x11b   :  { %v203_v18 = vpop.f32.mrb[1].mxu0  ;;  %v235_v19 = vpop.f32.mrb[1].mxu1 }
 0x11c   :  { %v494_v20 = vpop.f32.mrb[2].mxu0  ;;  %v502_v21 = vpop.f32.mrb[2].mxu1 }
 0x11d   :  { %v420_v22 = vpack.c.bf16 %v494_v20, %v493_v16  ;;  %v440_v23 = vpack.c.bf16 %v502_v21, %v501_v17  ;;  %v206_v24 = vpop.f32.mrb[3].mxu0  ;;  %v238_v25 = vpop.f32.mrb[3].mxu1 }
 0x11e   :  { %v415_v26 = vpack.c.bf16 %v206_v24, %v203_v18  ;;  %v435_v27 = vpack.c.bf16 %v238_v25, %v235_v19 }
 0x11f   :  { %452 = vst [vmem:[#allocation7 + $0x8] sm:$0xff] %v420_v22   ;;  %456 = vst [vmem:[#allocation7 + $0x28] sm:$0xff] %v440_v23  }
 0x120   :  { %416 = vst [vmem:[#allocation7] sm:$0xff] %v415_v26   ;;  %455 = vst [vmem:[#allocation7 + $0x20] sm:$0xff] %v435_v27  }
 0x122   :  { %v497_v28 = vpop.f32.mrb[4].mxu0  ;;  %v505_v29 = vpop.f32.mrb[4].mxu1 }
 0x123   :  { %v219_v30 = vpop.f32.mrb[5].mxu0  ;;  %v251_v31 = vpop.f32.mrb[5].mxu1 }
 0x124   :  { %v498_v32 = vpop.f32.mrb[6].mxu0  ;;  %v506_v33 = vpop.f32.mrb[6].mxu1 }
 0x125   :  { %v430_v34 = vpack.c.bf16 %v498_v32, %v497_v28  ;;  %v450_v35 = vpack.c.bf16 %v506_v33, %v505_v29  ;;  %v222_v36 = vpop.f32.mrb[7].mxu0  ;;  %v254_v37 = vpop.f32.mrb[7].mxu1 }
 0x126   :  { %v425_v38 = vpack.c.bf16 %v222_v36, %v219_v30  ;;  %v445_v39 = vpack.c.bf16 %v254_v37, %v251_v31 }
 0x127   :  { %454 = vst [vmem:[#allocation7 + $0x18] sm:$0xff] %v430_v34   ;;  %458 = vst [vmem:[#allocation7 + $0x38] sm:$0xff] %v450_v35  }
 0x128   :  { %453 = vst [vmem:[#allocation7 + $0x10] sm:$0xff] %v425_v38   ;;  %457 = vst [vmem:[#allocation7 + $0x30] sm:$0xff] %v445_v39  }
 0x129   :  { %599 = shalt.err (!%p596_p6)
}
 0x12a   :  { %s600_s10 = scalar_lea.hbm %s683_s2, 1024 }
 0x12b   :  { %p601_p7 = scmp.ne.s32.totalorder %s683_s2, %s600_s10  ;;  %p604_p8 = scmp.lt.u32.totalorder %s600_s10, %s683_s2 }
 0x12d   :  { %p606_p9 = pnand %p604_p8, %p601_p7 }
 0x12f   :  { %609 = shalt.err (!%p606_p9)
}
 0x130   :  { %357 = dma.vmem_to_hbm [thread:$0]  %s352_s6, 1024, %s683_s2, [#allocation4], %s617_s19, %s617_s19, %s618_s20  }
 0x131   :  { %614 = dma.done.wait [#allocation4], 1024  }
 0x132   :  { %615 = vsyncadd [#allocation4], 4294966272 }
 0x133   :  { %361 = vsyncpa [#allocation3], 1 }
 0x134   :  { %362 = vsyncpa [#allocation6], 1 }
 0x135   :  { %363 = vsyncpa [#allocation4], 1 }

</bundles_post_ra>
